<compile_context>
chip_gen: v5e
topology: v5e:2x2
jax: 0.10.0
libtpu: 0.0.40
codegen_flags: <defaults>
</compile_context>

<pallas_src>
import jax
import jax.numpy as jnp
from jax.experimental import pallas as pl
from jax.experimental.pallas import tpu as pltpu


def _round_up(x, m):
    return ((x + m - 1) // m) * m


def _choose_tm(batch):
    """Adaptive batch tile: as large as 512 to fill the MXU / amortize grid-step
    overhead, but never so large that the batch collapses to a single grid tile
    when >=2 tiles are possible (keeps both v7x TensorCores busy)."""
    b128 = _round_up(max(batch, 1), 128)
    return min(512, max(128, _round_up(b128 // 2, 128)))


def actor_v5_kernel(x_ref, w1_ref, b1_ref, w2_ref, b2_ref, w3_ref, b3_ref, out_ref):
    # own_fc: Linear(obs_dim, 512) + ReLU   (bf16 MXU operands, f32 accumulate)
    h1 = jnp.dot(x_ref[...], w1_ref[...], preferred_element_type=jnp.float32)
    h1 = jnp.maximum(h1 + b1_ref[...], 0.0)

    # action_out_V5 layer 1: Linear(512, 128) + ReLU
    h2 = jnp.dot(h1.astype(jnp.bfloat16), w2_ref[...],
                 preferred_element_type=jnp.float32)
    h2 = jnp.maximum(h2 + b2_ref[...], 0.0)

    # action_out_V5 layer 2: Linear(128, act_pad) + Tanh (EUP)
    h3 = jnp.dot(h2.astype(jnp.bfloat16), w3_ref[...],
                 preferred_element_type=jnp.float32)
    out_ref[...] = jnp.tanh(h3 + b3_ref[...])


def prepare_params(params):
    """One-time parameter prep:
       * cast weights (dot operands) to bf16; keep biases in f32,
       * zero-pad w3/b3 action columns to a lane-dense multiple of 128
         (padded cols come out as tanh(0)=0 and are sliced off outside)."""
    w1, b1, w2, b2, w3, b3 = params
    n_actions = w3.shape[1]
    act_pad = _round_up(n_actions, 128)

    w3p = jnp.zeros((w3.shape[0], act_pad), w3.dtype).at[:, :n_actions].set(w3)
    b3p = jnp.zeros((1, act_pad), b3.dtype).at[:, :n_actions].set(b3)

    return (w1.astype(jnp.bfloat16), b1.astype(jnp.float32),
            w2.astype(jnp.bfloat16), b2.astype(jnp.float32),
            w3p.astype(jnp.bfloat16), b3p.astype(jnp.float32))


def actor_forward(state, padded_params, n_actions, *, tm=None):
    """Fused MLP forward with a single (parallel) batch grid axis.

    state: [B, obs_dim]. Weights (bf16, already padded via prepare_params) are
    DMA'd once via constant index_maps, single-buffered, and stay VMEM-resident
    across batch tiles. Output is computed lane-dense as [B_pad, act_pad] f32
    and sliced to [B, n_actions] outside the kernel.
    """
    w1, b1, w2, b2, w3, b3 = padded_params
    B, obs_dim = state.shape
    assert obs_dim == w1.shape[0], "state feature dim must match own_fc in_features"
    h1_dim = w1.shape[1]        # 512
    h2_dim = w2.shape[1]        # 128
    act_pad = w3.shape[1]       # n_actions rounded up to 128

    if tm is None:
        tm = _choose_tm(B)
    b_pad = _round_up(max(B, 1), tm)

    # Pad only the batch axis; feature dim stays native (legal: block last dim
    # equals the full array dim). bf16 input halves the activation DMA.
    x = state.astype(jnp.bfloat16)
    if b_pad != B:
        x = jnp.pad(x, ((0, b_pad - B), (0, 0)))

    grid = (b_pad // tm,)
    resident = pl.Buffered(1)   # constant index_map -> no double-buffering needed

    out = pl.pallas_call(
        actor_v5_kernel,
        out_shape=jax.ShapeDtypeStruct((b_pad, act_pad), jnp.float32),
        grid=grid,
        in_specs=[
            pl.BlockSpec((tm, obs_dim), lambda i: (i, 0)),                          # state tile
            pl.BlockSpec((obs_dim, h1_dim), lambda i: (0, 0), pipeline_mode=resident),  # w1
            pl.BlockSpec((1, h1_dim), lambda i: (0, 0), pipeline_mode=resident),        # b1
            pl.BlockSpec((h1_dim, h2_dim), lambda i: (0, 0), pipeline_mode=resident),   # w2
            pl.BlockSpec((1, h2_dim), lambda i: (0, 0), pipeline_mode=resident),        # b2
            pl.BlockSpec((h2_dim, act_pad), lambda i: (0, 0), pipeline_mode=resident),  # w3
            pl.BlockSpec((1, act_pad), lambda i: (0, 0), pipeline_mode=resident),       # b3
        ],
        out_specs=pl.BlockSpec((tm, act_pad), lambda i: (i, 0)),                    # lane-dense out
        compiler_params=pltpu.CompilerParams(
            dimension_semantics=("parallel",),                                      # v7x megacore
        ),
    )(x, w1, b1, w2, b2, w3, b3)

    return out[:B, :n_actions]


def init_params(key, obs_dim, n_actions):
    """Deterministic synthetic init matching PyTorch layer shapes:
       own_fc:        Linear(obs_dim, 512)
       action_out_V5: Linear(512, 128), Linear(128, n_actions)
    Weights stored as [in, out] (transposed vs. torch's [out, in])."""
    ks = jax.random.split(key, 6)

    def lin(kw, kb, fan_in, fan_out):
        bound = 1.0 / jnp.sqrt(fan_in)
        w = jax.random.uniform(kw, (fan_in, fan_out), jnp.float32, -bound, bound)
        b = jax.random.uniform(kb, (1, fan_out), jnp.float32, -bound, bound)
        return w, b

    w1, b1 = lin(ks[0], ks[1], obs_dim, 512)
    w2, b2 = lin(ks[2], ks[3], 512, 128)
    w3, b3 = lin(ks[4], ks[5], 128, n_actions)
    return (w1, b1, w2, b2, w3, b3)


def actor_forward_ref(state, params):
    w1, b1, w2, b2, w3, b3 = params
    h1 = jnp.maximum(state @ w1 + b1, 0.0)
    h2 = jnp.maximum(h1 @ w2 + b2, 0.0)
    return jnp.tanh(h2 @ w3 + b3)


if __name__ == "__main__":
    key = jax.random.PRNGKey(0)
    k_x, k_p = jax.random.split(key)

    B = 2            # batch
    obs_dim = 16     # actor_obs[0]
    n_actions = 4

    state = jax.random.normal(k_x, (B, obs_dim), jnp.float32)
    params = init_params(k_p, obs_dim, n_actions)
    padded = prepare_params(params)

    out = jax.block_until_ready(actor_forward(state, padded, n_actions))
    ref = actor_forward_ref(state, params)
    assert out.shape == (B, n_actions)
    # bf16 MXU inputs (f32 accumulate) -> loosened tolerance vs. the f32 reference.
    assert jnp.allclose(out, ref, atol=5e-2, rtol=5e-2)

    # Bigger batch: exercises the adaptive tile (tm=256) and a 2-tile parallel
    # grid, plus padded batch rows (500 -> 512).
    k_x2, _ = jax.random.split(k_x)
    B2 = 500
    state_big = jax.random.normal(k_x2, (B2, obs_dim), jnp.float32)
    out_big = jax.block_until_ready(actor_forward(state_big, padded, n_actions))
    ref_big = actor_forward_ref(state_big, params)
    assert out_big.shape == (B2, n_actions)
    assert jnp.allclose(out_big, ref_big, atol=5e-2, rtol=5e-2)

    print("KERNEL_OK")
</pallas_src>

<mosaic_0001>
module attributes {stable_mosaic.version = 11 : i64} {
  func.func @actor_v5_kernel(%arg0: i32, %arg1: memref<128x16xbf16, #tpu.memory_space<vmem>>, %arg2: memref<16x512xbf16, #tpu.memory_space<vmem>>, %arg3: memref<1x512xf32, #tpu.memory_space<vmem>>, %arg4: memref<512x128xbf16, #tpu.memory_space<vmem>>, %arg5: memref<1x128xf32, #tpu.memory_space<vmem>>, %arg6: memref<128x128xbf16, #tpu.memory_space<vmem>>, %arg7: memref<1x128xf32, #tpu.memory_space<vmem>>, %arg8: memref<128x128xf32, #tpu.memory_space<vmem>>) attributes {dimension_semantics = [#tpu.dimension_semantics<parallel>], iteration_bounds = array<i64: 1>, scalar_prefetch = 0 : i64, scratch_operands = 0 : i64, tpu.core_type = #tpu.core_type<tc>, window_params = [{transform_indices = @transform_0, window_bounds = array<i64: 128, 16>}, {pipeline_mode = #tpu.pipeline_mode<synchronous>, transform_indices = @transform_1, window_bounds = array<i64: 16, 512>}, {pipeline_mode = #tpu.pipeline_mode<synchronous>, transform_indices = @transform_2, window_bounds = array<i64: 1, 512>}, {pipeline_mode = #tpu.pipeline_mode<synchronous>, transform_indices = @transform_3, window_bounds = array<i64: 512, 128>}, {pipeline_mode = #tpu.pipeline_mode<synchronous>, transform_indices = @transform_4, window_bounds = array<i64: 1, 128>}, {pipeline_mode = #tpu.pipeline_mode<synchronous>, transform_indices = @transform_5, window_bounds = array<i64: 128, 128>}, {pipeline_mode = #tpu.pipeline_mode<synchronous>, transform_indices = @transform_6, window_bounds = array<i64: 1, 128>}, {transform_indices = @transform_7, window_bounds = array<i64: 128, 128>}]} {
    %c0 = arith.constant 0 : index
    %c0_0 = arith.constant 0 : index
    %0 = vector.load %arg1[%c0, %c0_0] : memref<128x16xbf16, #tpu.memory_space<vmem>>, vector<128x16xbf16>
    %c0_1 = arith.constant 0 : index
    %c0_2 = arith.constant 0 : index
    %1 = vector.load %arg2[%c0_1, %c0_2] : memref<16x512xbf16, #tpu.memory_space<vmem>>, vector<16x512xbf16>
    %cst = arith.constant dense<0.000000e+00> : vector<128x512xf32>
    %2 = tpu.matmul %0, %1, %cst {dimension_numbers = #tpu.dot_dimension_numbers<[1], [0], [0], [1], [0, 0, 1, 1], [], []>} : vector<128x16xbf16>, vector<16x512xbf16>, vector<128x512xf32> -> vector<128x512xf32>
    %c0_3 = arith.constant 0 : index
    %c0_4 = arith.constant 0 : index
    %3 = vector.load %arg3[%c0_3, %c0_4] : memref<1x512xf32, #tpu.memory_space<vmem>>, vector<1x512xf32>
    %4 = vector.broadcast %3 : vector<1x512xf32> to vector<128x512xf32>
    %5 = arith.addf %2, %4 : vector<128x512xf32>
    %cst_5 = arith.constant 0.000000e+00 : f32
    %6 = vector.broadcast %cst_5 : f32 to vector<128x512xf32>
    %7 = arith.maximumf %5, %6 : vector<128x512xf32>
    %8 = arith.truncf %7 : vector<128x512xf32> to vector<128x512xbf16>
    %c0_6 = arith.constant 0 : index
    %c0_7 = arith.constant 0 : index
    %9 = vector.load %arg4[%c0_6, %c0_7] : memref<512x128xbf16, #tpu.memory_space<vmem>>, vector<512x128xbf16>
    %cst_8 = arith.constant dense<0.000000e+00> : vector<128x128xf32>
    %10 = tpu.matmul %8, %9, %cst_8 {dimension_numbers = #tpu.dot_dimension_numbers<[1], [0], [0], [1], [0, 0, 1, 1], [], []>} : vector<128x512xbf16>, vector<512x128xbf16>, vector<128x128xf32> -> vector<128x128xf32>
    %c0_9 = arith.constant 0 : index
    %c0_10 = arith.constant 0 : index
    %11 = vector.load %arg5[%c0_9, %c0_10] : memref<1x128xf32, #tpu.memory_space<vmem>>, vector<1x128xf32>
    %12 = vector.broadcast %11 : vector<1x128xf32> to vector<128x128xf32>
    %13 = arith.addf %10, %12 : vector<128x128xf32>
    %cst_11 = arith.constant 0.000000e+00 : f32
    %14 = vector.broadcast %cst_11 : f32 to vector<128x128xf32>
    %15 = arith.maximumf %13, %14 : vector<128x128xf32>
    %16 = arith.truncf %15 : vector<128x128xf32> to vector<128x128xbf16>
    %c0_12 = arith.constant 0 : index
    %c0_13 = arith.constant 0 : index
    %17 = vector.load %arg6[%c0_12, %c0_13] : memref<128x128xbf16, #tpu.memory_space<vmem>>, vector<128x128xbf16>
    %cst_14 = arith.constant dense<0.000000e+00> : vector<128x128xf32>
    %18 = tpu.matmul %16, %17, %cst_14 {dimension_numbers = #tpu.dot_dimension_numbers<[1], [0], [0], [1], [0, 0, 1, 1], [], []>} : vector<128x128xbf16>, vector<128x128xbf16>, vector<128x128xf32> -> vector<128x128xf32>
    %c0_15 = arith.constant 0 : index
    %c0_16 = arith.constant 0 : index
    %19 = vector.load %arg7[%c0_15, %c0_16] : memref<1x128xf32, #tpu.memory_space<vmem>>, vector<1x128xf32>
    %20 = vector.broadcast %19 : vector<1x128xf32> to vector<128x128xf32>
    %21 = arith.addf %18, %20 : vector<128x128xf32>
    %22 = math.tanh %21 : vector<128x128xf32>
    %c0_17 = arith.constant 0 : index
    %c0_18 = arith.constant 0 : index
    %23 = vector.load %arg8[%c0_17, %c0_18] : memref<128x128xf32, #tpu.memory_space<vmem>>, vector<128x128xf32>
    tpu.vector_store %arg8[%c0_17, %c0_18], %22 {strides = array<i32>} : memref<128x128xf32, #tpu.memory_space<vmem>>, vector<128x128xf32>,
    return
  }
  func.func @transform_0(%arg0: i32) -> (i32, i32) {
    %c0_i32 = arith.constant 0 : i32
    %c0_i32_0 = arith.constant 0 : i32
    return %arg0, %c0_i32 : i32, i32
  }
  func.func @transform_1(%arg0: i32) -> (i32, i32) {
    %c0_i32 = arith.constant 0 : i32
    %c0_i32_0 = arith.constant 0 : i32
    %c0_i32_1 = arith.constant 0 : i32
    return %c0_i32, %c0_i32_0 : i32, i32
  }
  func.func @transform_2(%arg0: i32) -> (i32, i32) {
    %c0_i32 = arith.constant 0 : i32
    %c0_i32_0 = arith.constant 0 : i32
    %c0_i32_1 = arith.constant 0 : i32
    return %c0_i32, %c0_i32_0 : i32, i32
  }
  func.func @transform_3(%arg0: i32) -> (i32, i32) {
    %c0_i32 = arith.constant 0 : i32
    %c0_i32_0 = arith.constant 0 : i32
    %c0_i32_1 = arith.constant 0 : i32
    return %c0_i32, %c0_i32_0 : i32, i32
  }
  func.func @transform_4(%arg0: i32) -> (i32, i32) {
    %c0_i32 = arith.constant 0 : i32
    %c0_i32_0 = arith.constant 0 : i32
    %c0_i32_1 = arith.constant 0 : i32
    return %c0_i32, %c0_i32_0 : i32, i32
  }
  func.func @transform_5(%arg0: i32) -> (i32, i32) {
    %c0_i32 = arith.constant 0 : i32
    %c0_i32_0 = arith.constant 0 : i32
    %c0_i32_1 = arith.constant 0 : i32
    return %c0_i32, %c0_i32_0 : i32, i32
  }
  func.func @transform_6(%arg0: i32) -> (i32, i32) {
    %c0_i32 = arith.constant 0 : i32
    %c0_i32_0 = arith.constant 0 : i32
    %c0_i32_1 = arith.constant 0 : i32
    return %c0_i32, %c0_i32_0 : i32, i32
  }
  func.func @transform_7(%arg0: i32) -> (i32, i32) {
    %c0_i32 = arith.constant 0 : i32
    %c0_i32_0 = arith.constant 0 : i32
    return %arg0, %c0_i32 : i32, i32
  }
}

</mosaic_0001>

<bundles_post_ra>
// kernel: tpu_custom_call.1
= control target key start
LH: loop header
LB: loop body
LE: loop exit
PB: predicated region body
PF: predicated region fallthrough
CT: control target
= control target key end

     0   :  { %12 = vsyncpa [#allocation3], 0  ;;  %s1832_s0 = inlined_call_operand.vmem [shape: bf16[128,16], index: 0, kind: input, shape index: {}]   ;;  %s1833_s1 = inlined_call_operand.hbm [shape: bf16[16,512], index: 1, kind: input, shape index: {}]   ;;  %s1834_s2 = inlined_call_operand.vmem [shape: f32[1,512], index: 2, kind: input, shape index: {}]   ;;  %s1835_s3 = inlined_call_operand.hbm [shape: bf16[512,128], index: 3, kind: input, shape index: {}]   ;;  %s1836_s4 = inlined_call_operand.vmem [shape: f32[1,128], index: 4, kind: input, shape index: {}]   ;;  %s1837_s5 = inlined_call_operand.vmem [shape: bf16[128,128], index: 5, kind: input, shape index: {}]   ;;  %s1838_s6 = inlined_call_operand.vmem [shape: f32[1,128], index: 6, kind: input, shape index: {}]   ;;  %s1839_s7 = inlined_call_operand.hbm [shape: f32[128,128], index: 7, kind: output, shape index: {}]  }
   0x1   :  { %13 = vsyncpa [#allocation6], 0 }
   0x2   :  { %14 = vsyncpa [#allocation4], 0  ;;  %s21_s26 = sshll.u32 %s1833_s1, 4  ;;  %s1532_s27 = smov [#allocation2]   ;;  %s22_s26 = int_to_ptr.hbm [resolvable:$true] %s21_s26 }
   0x3   :  { %s23_s28 = sshll.u32 %s1532_s27, 4  ;;  %s36_s8 = sshll.u32 %s1835_s3, 4  ;;  %s24_s28 = int_to_ptr.vmem [resolvable:$true] %s23_s28  ;;  %s37_s8 = int_to_ptr.hbm [resolvable:$true] %s36_s8 }
   0x4   :  { %s1533_s9 = smov 256   ;;  %s1534_s10 = smov 16  }
   0x5   :  { %29 = dma.hbm_to_vmem [thread:$0]  %s22_s26, 512, %s24_s28, [#allocation3], %s1533_s9, %s1533_s9, %s1534_s10  }
   0x6   :  { %s1535_s11 = smov [#allocation5]   ;;  %s1536_s13 = smov 64  }
   0x7   :  { %s38_s12 = sshll.u32 %s1535_s11, 4  ;;  %s1537_s14 = smov 4   ;;  %s39_s12 = int_to_ptr.vmem [resolvable:$true] %s38_s12 }
   0x8   :  { %44 = dma.hbm_to_vmem [thread:$0]  %s37_s8, 4096, %s39_s12, [#allocation6], %s1536_s13, %s1536_s13, %s1537_s14  }
   0x9   :  { %1526 = dma.done.wait [#allocation3], 512  }
   0xa   :  { %1527 = vsyncadd [#allocation3], 4294966784 }
   0xb   :  { %1528 = dma.done.wait [#allocation6], 4096  }
   0xc   :  { %1529 = vsyncadd [#allocation6], 4294963200  ;;  %v1150_v0 = vld [vmem:[#allocation2] sm:$0xf]  ;;  %v1366_v1 = vld [vmem:[#allocation2 + $0xc] sm:$0xf0] }
   0xd   :  { %v1356_v2 = vld [vmem:[%s1832_s0] sm:$0xff]  ;;  %v1151_v3 = vor.u32 %v1366_v1, %v1150_v0  ;;  %vm150_vm0 = vcmask 130048   ;;  %v1358_v4 = vld [vmem:[%s1832_s0 + $0x10] sm:$0xff]  ;;  %v1158_v7 = vld [vmem:[#allocation2 + $0x8] sm:$0xf]  ;;  %s1102_s25 = sshll.u32 %s1839_s7, 4  ;;  %s1103_s25 = int_to_ptr.hbm [resolvable:$true] %s1102_s25 }
   0xe   :  { %v1596_v5 = vld [vmem:[%s1832_s0 + $0x20] sm:$0xff]  ;;  %v1601_v6 = vld [vmem:[%s1832_s0 + $0x30] sm:$0xff]  ;;  %v1367_v8 = vld [vmem:[#allocation2 + $0x14] sm:$0xf0]  ;;  %s1539_s26 = smov 128   ;;  %s1540_s27 = smov 8  }
   0xf   :  { %v1365_v9 = vld [vmem:[#allocation2 + $0xc] sm:$0xf]  ;;  %182 = vmatpush.bf16.msra.mxu0 %v1151_v3  ;;  %1408 = vmatpush.bf16.msra.mxu1 %v1151_v3  ;;  %v1159_v10 = vor.u32 %v1367_v8, %v1158_v7  ;;  %v1160_v11 = vld [vmem:[#allocation2 + $0x18] sm:$0xf0]  ;;  %v1364_v12 = vld [vmem:[#allocation2 + $0x4] sm:$0xf] }
  0x10   :  { %v1152_v13 = vld [vmem:[#allocation2 + $0x10] sm:$0xf0]  ;;  %1409 = vmatpush.bf16.msra.mxu2 %v1151_v3  ;;  %1410 = vmatpush.bf16.msra.mxu3 %v1151_v3  ;;  %v1163_v14 = vor.u32 %v1365_v9, %v1160_v11  ;;  %v1357_v16 = vld [vmem:[%s1832_s0 + $0x8] sm:$0xff]  ;;  %v1359_v17 = vld [vmem:[%s1832_s0 + $0x18] sm:$0xff] }
  0x11   :  { %v1155_v15 = vor.u32 %v1364_v12, %v1152_v13  ;;  %v1618_v18 = vld [vmem:[%s1832_s0 + $0x28] sm:$0xff]  ;;  %v1623_v19 = vld [vmem:[%s1832_s0 + $0x38] sm:$0xff]  ;;  %v1390_v23 = vld [vmem:[#allocation5 + $0xb0] sm:$0xff] }
  0x12   :  { %1164 = vmatmul.msk.bf16.vlgmr.msra.gmra.mxu0 %vm150_vm0, %v1356_v2  ;;  %1166 = vmatmul.msk.bf16.vlgmr.msra.gmra.mxu1 %vm150_vm0, %v1358_v4  ;;  %v1391_v20 = vld [vmem:[#allocation5 + $0xb8] sm:$0xff]  ;;  %v1398_v24 = vld [vmem:[#allocation5 + $0xf0] sm:$0xff]  ;;  %v1389_v26 = vld [vmem:[#allocation5 + $0xa8] sm:$0xff] }
  0x13   :  { %1168 = vmatmul.msk.bf16.vlgmr.msra.gmra.mxu2 %vm150_vm0, %v1596_v5  ;;  %1170 = vmatmul.msk.bf16.vlgmr.msra.gmra.mxu3 %vm150_vm0, %v1601_v6  ;;  %v1399_v21 = vld [vmem:[#allocation5 + $0xf8] sm:$0xff]  ;;  %v1382_v25 = vld [vmem:[#allocation5 + $0x70] sm:$0xff]  ;;  %v1397_v27 = vld [vmem:[#allocation5 + $0xe8] sm:$0xff] }
  0x14   :  { %280 = vmatpush.bf16.msrb.mxu2 %v1159_v10  ;;  %329 = vmatpush.bf16.msrb.mxu3 %v1163_v14  ;;  %v1383_v22 = vld [vmem:[#allocation5 + $0x78] sm:$0xff]  ;;  %v1381_v28 = vld [vmem:[#allocation5 + $0x68] sm:$0xff]  ;;  %v1388_v29 = vld [vmem:[#allocation5 + $0xa0] sm:$0xff] }
  0x15   :  { %231 = vmatpush.bf16.msrb.mxu1 %v1155_v15  ;;  %v1396_v30 = vld [vmem:[#allocation5 + $0xe0] sm:$0xff]  ;;  %v1375_v32 = vld [vmem:[#allocation5 + $0x38] sm:$0xff]  ;;  %v1374_v33 = vld [vmem:[#allocation5 + $0x30] sm:$0xff] }
  0x16   :  { %v1380_v31 = vld [vmem:[#allocation5 + $0x60] sm:$0xff]  ;;  %727 = vmatpush.bf16.msrb.mxu0 %v1375_v32  ;;  %v1387_v34 = vld [vmem:[#allocation5 + $0x98] sm:$0xff]  ;;  %v1373_v36 = vld [vmem:[#allocation5 + $0x28] sm:$0xff] }
  0x17   :  { %v1395_v35 = vld [vmem:[#allocation5 + $0xd8] sm:$0xff]  ;;  %v1372_v38 = vld [vmem:[#allocation5 + $0x20] sm:$0xff]  ;;  %v1370_v40 = vld [vmem:[#allocation5 + $0x10] sm:$0xff] }
  0x18   :  { %825 = vmatpush.bf16.msra.mxu2 %v1391_v20  ;;  %874 = vmatpush.bf16.msra.mxu3 %v1399_v21  ;;  %v1379_v37 = vld [vmem:[#allocation5 + $0x58] sm:$0xff]  ;;  %v1386_v41 = vld [vmem:[#allocation5 + $0x90] sm:$0xff]  ;;  %v1369_v42 = vld [vmem:[#allocation5 + $0x8] sm:$0xff] }
  0x19   :  { %776 = vmatpush.bf16.msra.mxu1 %v1383_v22  ;;  %v1371_v39 = vld [vmem:[#allocation5 + $0x18] sm:$0xff]  ;;  %v1394_v43 = vld [vmem:[#allocation5 + $0xd0] sm:$0xff]  ;;  %v1368_v45 = vld [vmem:[#allocation5] sm:$0xff] }
  0x1a   :  { %728 = vmatpush.bf16.msrb.mxu0 %v1374_v33  ;;  %v1378_v44 = vld [vmem:[#allocation5 + $0x50] sm:$0xff]  ;;  %v1385_v46 = vld [vmem:[#allocation5 + $0x88] sm:$0xff]  ;;  %v1658_v49 = vld [vmem:[%s1834_s2] sm:$0xf] }
  0x1b   :  { %v1393_v47 = vld [vmem:[#allocation5 + $0xc8] sm:$0xff]  ;;  %v1661_v52 = vperm.slane %v1658_v49, 0  ;;  %v1384_v53 = vld [vmem:[#allocation5 + $0x80] sm:$0xff] }
  0x1c   :  { %826 = vmatpush.bf16.msra.mxu2 %v1390_v23  ;;  %875 = vmatpush.bf16.msra.mxu3 %v1398_v24  ;;  %v1377_v48 = vld [vmem:[#allocation5 + $0x48] sm:$0xff]  ;;  %v1392_v63 = vld [vmem:[#allocation5 + $0xc0] sm:$0xff] }
  0x1d   :  { %777 = vmatpush.bf16.msra.mxu1 %v1382_v25  ;;  %v1376_v1 = vld [vmem:[#allocation5 + $0x40] sm:$0xff] }
  0x1e   :  { %729 = vmatpush.bf16.msrb.mxu0 %v1373_v36 }
  0x20   :  { %827 = vmatpush.bf16.msra.mxu2 %v1389_v26  ;;  %876 = vmatpush.bf16.msra.mxu3 %v1397_v27 }
  0x21   :  { %778 = vmatpush.bf16.msra.mxu1 %v1381_v28 }
  0x22   :  { %1165 = vmatmul.msk.bf16.gmra.mxu0 %vm150_vm0, %v1357_v16  ;;  %1167 = vmatmul.msk.bf16.gmra.mxu1 %vm150_vm0, %v1359_v17 }
  0x23   :  { %1169 = vmatmul.msk.bf16.gmra.mxu2 %vm150_vm0, %v1618_v18  ;;  %1171 = vmatmul.msk.bf16.gmra.mxu3 %vm150_vm0, %v1623_v19 }
  0x24   :  { %828 = vmatpush.bf16.msra.mxu2 %v1388_v29  ;;  %877 = vmatpush.bf16.msra.mxu3 %v1396_v30 }
  0x25   :  { %779 = vmatpush.bf16.msra.mxu1 %v1380_v31  ;;  %730 = vmatpush.bf16.msrb.mxu0 %v1372_v38  ;;  %v1694_v31 = vperm.slane %v1658_v49, 1 }
  0x28   :  { %829 = vmatpush.bf16.msra.mxu2 %v1387_v34  ;;  %878 = vmatpush.bf16.msra.mxu3 %v1395_v35 }
  0x29   :  { %780 = vmatpush.bf16.msra.mxu1 %v1379_v37  ;;  %731 = vmatpush.bf16.msrb.mxu0 %v1371_v39 }
  0x2c   :  { %830 = vmatpush.bf16.msra.mxu2 %v1386_v41  ;;  %879 = vmatpush.bf16.msra.mxu3 %v1394_v43 }
  0x2d   :  { %732 = vmatpush.bf16.msrb.mxu0 %v1370_v40  ;;  %781 = vmatpush.bf16.msra.mxu1 %v1378_v44 }
  0x30   :  { %831 = vmatpush.bf16.msra.mxu2 %v1385_v46  ;;  %880 = vmatpush.bf16.msra.mxu3 %v1393_v47 }
  0x31   :  { %733 = vmatpush.bf16.msrb.mxu0 %v1369_v42  ;;  %782 = vmatpush.bf16.msra.mxu1 %v1377_v48  ;;  %v1705_v48 = vperm.slane %v1658_v49, 2 }
  0x32   :  { %1172 = vmatmul.msk.bf16.vlgmr.msrb.gmra.mxu1 %vm150_vm0, %v1356_v2 }
  0x33   :  { %1180 = vmatmul.msk.bf16.vlgmr.msrb.gmra.mxu2 %vm150_vm0, %v1356_v2  ;;  %1188 = vmatmul.msk.bf16.vlgmr.msrb.gmra.mxu3 %vm150_vm0, %v1356_v2 }
  0x34   :  { %832 = vmatpush.bf16.msra.mxu2 %v1384_v53  ;;  %881 = vmatpush.bf16.msra.mxu3 %v1392_v63 }
  0x35   :  { %734 = vmatpush.bf16.msrb.mxu0 %v1368_v45  ;;  %783 = vmatpush.bf16.msra.mxu1 %v1376_v1 }
  0x42   :  { %1173 = vmatmul.msk.bf16.gmra.mxu1 %vm150_vm0, %v1357_v16 }
  0x43   :  { %1181 = vmatmul.msk.bf16.gmra.mxu2 %vm150_vm0, %v1357_v16  ;;  %1189 = vmatmul.msk.bf16.gmra.mxu3 %vm150_vm0, %v1357_v16 }
  0x52   :  { %1174 = vmatmul.msk.bf16.gmra.mxu1 %vm150_vm0, %v1358_v4 }
  0x53   :  { %1182 = vmatmul.msk.bf16.gmra.mxu2 %vm150_vm0, %v1358_v4  ;;  %1190 = vmatmul.msk.bf16.gmra.mxu3 %vm150_vm0, %v1358_v4 }
  0x62   :  { %1175 = vmatmul.msk.bf16.gmra.mxu1 %vm150_vm0, %v1359_v17 }
  0x63   :  { %1183 = vmatmul.msk.bf16.gmra.mxu2 %vm150_vm0, %v1359_v17  ;;  %1191 = vmatmul.msk.bf16.gmra.mxu3 %vm150_vm0, %v1359_v17 }
  0x72   :  { %1176 = vmatmul.msk.bf16.gmra.mxu1 %vm150_vm0, %v1596_v5 }
  0x73   :  { %1184 = vmatmul.msk.bf16.gmra.mxu2 %vm150_vm0, %v1596_v5  ;;  %1192 = vmatmul.msk.bf16.gmra.mxu3 %vm150_vm0, %v1596_v5 }
  0x82   :  { %1177 = vmatmul.msk.bf16.gmra.mxu1 %vm150_vm0, %v1618_v18 }
  0x83   :  { %1185 = vmatmul.msk.bf16.gmra.mxu2 %vm150_vm0, %v1618_v18  ;;  %1193 = vmatmul.msk.bf16.gmra.mxu3 %vm150_vm0, %v1618_v18 }
  0x8f   :  { %v184_v50 = vpop.f32.mrf.mxu0  ;;  %v194_v51 = vpop.f32.mrf.mxu1 }
  0x90   :  { %v185_v54 = vadd.f32 %v184_v50, %v1661_v52  ;;  %v195_v38 = vadd.f32 %v194_v51, %v1661_v52  ;;  %v1708_v50 = vperm.slane %v1658_v49, 3  ;;  %v1407_v51 = vld [vmem:[%s1837_s5 + $0x38] sm:$0xff] }
  0x91   :  { %1015 = vmatpush.bf16.msra.mxu0 %v1407_v51 }
  0x92   :  { %1178 = vmatmul.msk.bf16.gmra.mxu1 %vm150_vm0, %v1601_v6  ;;  %v371_v61 = vmax.f32 %v185_v54, 0.0  ;;  %v387_v44 = vmax.f32 %v195_v38, 0.0 }
  0x93   :  { %1186 = vmatmul.msk.bf16.gmra.mxu2 %vm150_vm0, %v1601_v6  ;;  %1194 = vmatmul.msk.bf16.gmra.mxu3 %vm150_vm0, %v1601_v6 }
  0x96   :  { %v204_v55 = vpop.f32.mrf.mxu2  ;;  %v214_v56 = vpop.f32.mrf.mxu3 }
  0x97   :  { %v205_v57 = vadd.f32 %v204_v55, %v1661_v52  ;;  %v215_v58 = vadd.f32 %v214_v56, %v1661_v52  ;;  %v186_v59 = vpop.f32.mrf.mxu0  ;;  %v196_v60 = vpop.f32.mrf.mxu1 }
  0x98   :  { %v187_v62 = vadd.f32 %v186_v59, %v1661_v52  ;;  %v197_v39 = vadd.f32 %v196_v60, %v1661_v52 }
  0x99   :  { %v403_v9 = vmax.f32 %v205_v57, 0.0  ;;  %v419_v10 = vmax.f32 %v215_v58, 0.0 }
  0x9a   :  { %v375_v0 = vmax.f32 %v187_v62, 0.0  ;;  %v391_v45 = vmax.f32 %v197_v39, 0.0 }
  0x9c   :  { %v435_v2 = vpack.c.bf16 %v375_v0, %v371_v61  ;;  %v443_v55 = vpack.c.bf16 %v391_v45, %v387_v44 }
  0x9e   :  { %v206_v3 = vpop.f32.mrf.mxu2  ;;  %v216_v4 = vpop.f32.mrf.mxu3  ;;  %735 = vmatmul.bf16.vlgmr.msrb.gmra.mxu0 %v435_v2 }
  0x9f   :  { %v207_v5 = vadd.f32 %v206_v3, %v1661_v52  ;;  %v217_v6 = vadd.f32 %v216_v4, %v1661_v52  ;;  %v189_v7 = vpop.f32.mrf.mxu0  ;;  %v1675_v8 = vpop.f32.mrf.mxu1 }
  0xa0   :  { %v190_v15 = vadd.f32 %v189_v7, %v1661_v52  ;;  %v200_v4 = vadd.f32 %v1675_v8, %v1661_v52 }
  0xa1   :  { %v407_v11 = vmax.f32 %v207_v5, 0.0  ;;  %v423_v12 = vmax.f32 %v217_v6, 0.0 }
  0xa2   :  { %1179 = vmatmul.msk.bf16.gmra.mxu1 %vm150_vm0, %v1623_v19  ;;  %v379_v23 = vmax.f32 %v190_v15, 0.0 }
  0xa3   :  { %1187 = vmatmul.msk.bf16.gmra.mxu2 %vm150_vm0, %v1623_v19  ;;  %1195 = vmatmul.msk.bf16.gmra.mxu3 %vm150_vm0, %v1623_v19  ;;  %v1683_v13 = vpack.c.bf16 %v407_v11, %v403_v9  ;;  %v1685_v14 = vpack.c.bf16 %v423_v12, %v419_v10  ;;  %v395_v11 = vmax.f32 %v200_v4, 0.0 }
  0xa6   :  { %v209_v16 = vpop.f32.mrf.mxu2  ;;  %v219_v17 = vpop.f32.mrf.mxu3 }
  0xa7   :  { %v210_v18 = vadd.f32 %v209_v16, %v1661_v52  ;;  %v220_v20 = vadd.f32 %v219_v17, %v1661_v52  ;;  %v191_v21 = vpop.f32.mrf.mxu0  ;;  %v201_v22 = vpop.f32.mrf.mxu1 }
  0xa8   :  { %v192_v24 = vadd.f32 %v191_v21, %v1661_v52  ;;  %v202_v5 = vadd.f32 %v201_v22, %v1661_v52 }
  0xa9   :  { %v411_v32 = vmax.f32 %v210_v18, 0.0  ;;  %v427_v33 = vmax.f32 %v220_v20, 0.0  ;;  %v1406_v18 = vld [vmem:[%s1837_s5 + $0x30] sm:$0xff] }
  0xaa   :  { %v383_v25 = vmax.f32 %v192_v24, 0.0  ;;  %v399_v12 = vmax.f32 %v202_v5, 0.0  ;;  %1016 = vmatpush.bf16.msra.mxu0 %v1406_v18 }
  0xac   :  { %v439_v26 = vpack.c.bf16 %v383_v25, %v379_v23  ;;  %v447_v8 = vpack.c.bf16 %v399_v12, %v395_v11 }
  0xae   :  { %v211_v19 = vpop.f32.mrf.mxu2  ;;  %v221_v27 = vpop.f32.mrf.mxu3  ;;  %740 = vmatmul.bf16.gmra.mxu0 %v439_v26 }
  0xaf   :  { %v212_v28 = vadd.f32 %v211_v19, %v1661_v52  ;;  %v222_v29 = vadd.f32 %v221_v27, %v1661_v52  ;;  %v233_v30 = vpop.f32.mrf.mxu1 }
  0xb0   :  { %v234_v40 = vadd.f32 %v233_v30, %v1694_v31 }
  0xb1   :  { %v415_v34 = vmax.f32 %v212_v28, 0.0  ;;  %v431_v35 = vmax.f32 %v222_v29, 0.0 }
  0xb2   :  { %v372_v46 = vmax.f32 %v234_v40, 0.0 }
  0xb3   :  { %v1696_v36 = vpack.c.bf16 %v415_v34, %v411_v32  ;;  %v1698_v37 = vpack.c.bf16 %v431_v35, %v427_v33 }
  0xb6   :  { %v282_v41 = vpop.f32.mrf.mxu2  ;;  %v331_v42 = vpop.f32.mrf.mxu3 }
  0xb7   :  { %v235_v43 = vpop.f32.mrf.mxu1  ;;  %v283_v56 = vadd.f32 %v282_v41, %v1705_v48  ;;  %v332_v57 = vadd.f32 %v331_v42, %v1708_v50 }
  0xb8   :  { %v236_v47 = vadd.f32 %v235_v43, %v1694_v31  ;;  %v1405_v43 = vld [vmem:[%s1837_s5 + $0x28] sm:$0xff] }
  0xb9   :  { %v373_v62 = vmax.f32 %v283_v56, 0.0  ;;  %v374_v63 = vmax.f32 %v332_v57, 0.0  ;;  %1017 = vmatpush.bf16.msra.mxu0 %v1405_v43 }
  0xba   :  { %v376_v53 = vmax.f32 %v236_v47, 0.0 }
  0xbc   :  { %v436_v54 = vpack.c.bf16 %v376_v53, %v372_v46 }
  0xbe   :  { %v284_v58 = vpop.f32.mrf.mxu2  ;;  %v333_v59 = vpop.f32.mrf.mxu3  ;;  %745 = vmatmul.bf16.gmra.mxu0 %v443_v55  ;;  %784 = vmatmul.bf16.vlgmr.msra.gmra.mxu1 %v436_v54 }
  0xbf   :  { %v285_v60 = vadd.f32 %v284_v58, %v1705_v48  ;;  %v334_v49 = vadd.f32 %v333_v59, %v1708_v50  ;;  %v238_v61 = vpop.f32.mrf.mxu1 }
  0xc0   :  { %v239_v6 = vadd.f32 %v238_v61, %v1694_v31 }
  0xc1   :  { %v377_v0 = vmax.f32 %v285_v60, 0.0  ;;  %v378_v1 = vmax.f32 %v334_v49, 0.0 }
  0xc2   :  { %v380_v15 = vmax.f32 %v239_v6, 0.0 }
  0xc3   :  { %v437_v2 = vpack.c.bf16 %v377_v0, %v373_v62  ;;  %v438_v3 = vpack.c.bf16 %v378_v1, %v374_v63 }
  0xc5   :  { %833 = vmatmul.bf16.vlgmr.msra.gmra.mxu2 %v437_v2  ;;  %882 = vmatmul.bf16.vlgmr.msra.gmra.mxu3 %v438_v3  ;;  %v1404_v3 = vld [vmem:[%s1837_s5 + $0x20] sm:$0xff] }
  0xc6   :  { %v287_v7 = vpop.f32.mrf.mxu2  ;;  %v336_v9 = vpop.f32.mrf.mxu3  ;;  %1018 = vmatpush.bf16.msra.mxu0 %v1404_v3 }
  0xc7   :  { %v240_v10 = vpop.f32.mrf.mxu1  ;;  %v288_v52 = vadd.f32 %v287_v7, %v1705_v48  ;;  %v337_v21 = vadd.f32 %v336_v9, %v1708_v50 }
  0xc8   :  { %v241_v16 = vadd.f32 %v240_v10, %v1694_v31 }
  0xc9   :  { %v381_v19 = vmax.f32 %v288_v52, 0.0  ;;  %v382_v27 = vmax.f32 %v337_v21, 0.0 }
  0xca   :  { %v384_v17 = vmax.f32 %v241_v16, 0.0 }
  0xcc   :  { %v440_v20 = vpack.c.bf16 %v384_v17, %v380_v15 }
  0xce   :  { %v289_v22 = vpop.f32.mrf.mxu2  ;;  %v338_v23 = vpop.f32.mrf.mxu3  ;;  %750 = vmatmul.bf16.gmra.mxu0 %v447_v8  ;;  %789 = vmatmul.bf16.gmra.mxu1 %v440_v20 }
  0xcf   :  { %v290_v24 = vadd.f32 %v289_v22, %v1705_v48  ;;  %v339_v25 = vadd.f32 %v338_v23, %v1708_v50  ;;  %v243_v26 = vpop.f32.mrf.mxu1 }
  0xd0   :  { %v244_v33 = vadd.f32 %v243_v26, %v1694_v31  ;;  %v1403_v26 = vld [vmem:[%s1837_s5 + $0x18] sm:$0xff] }
  0xd1   :  { %v385_v28 = vmax.f32 %v290_v24, 0.0  ;;  %v386_v29 = vmax.f32 %v339_v25, 0.0  ;;  %1019 = vmatpush.bf16.msra.mxu0 %v1403_v26 }
  0xd2   :  { %v388_v39 = vmax.f32 %v244_v33, 0.0 }
  0xd3   :  { %v441_v30 = vpack.c.bf16 %v385_v28, %v381_v19  ;;  %v442_v32 = vpack.c.bf16 %v386_v29, %v382_v27 }
  0xd5   :  { %838 = vmatmul.bf16.gmra.mxu2 %v441_v30  ;;  %887 = vmatmul.bf16.gmra.mxu3 %v442_v32 }
  0xd6   :  { %v292_v34 = vpop.f32.mrf.mxu2  ;;  %v341_v35 = vpop.f32.mrf.mxu3 }
  0xd7   :  { %v245_v38 = vpop.f32.mrf.mxu1  ;;  %v293_v44 = vadd.f32 %v292_v34, %v1705_v48  ;;  %v342_v45 = vadd.f32 %v341_v35, %v1708_v50 }
  0xd8   :  { %v246_v40 = vadd.f32 %v245_v38, %v1694_v31 }
  0xd9   :  { %v389_v55 = vmax.f32 %v293_v44, 0.0  ;;  %v390_v56 = vmax.f32 %v342_v45, 0.0 }
  0xda   :  { %v392_v41 = vmax.f32 %v246_v40, 0.0 }
  0xdc   :  { %v444_v42 = vpack.c.bf16 %v392_v41, %v388_v39 }
  0xde   :  { %v294_v46 = vpop.f32.mrf.mxu2  ;;  %v343_v47 = vpop.f32.mrf.mxu3  ;;  %755 = vmatmul.bf16.gmra.mxu0 %v1683_v13  ;;  %794 = vmatmul.bf16.gmra.mxu1 %v444_v42 }
  0xdf   :  { %v295_v53 = vadd.f32 %v294_v46, %v1705_v48  ;;  %v344_v51 = vadd.f32 %v343_v47, %v1708_v50  ;;  %v248_v54 = vpop.f32.mrf.mxu1 }
  0xe0   :  { %v249_v49 = vadd.f32 %v248_v54, %v1694_v31 }
  0xe1   :  { %v393_v57 = vmax.f32 %v295_v53, 0.0  ;;  %v394_v58 = vmax.f32 %v344_v51, 0.0  ;;  %v1402_v51 = vld [vmem:[%s1837_s5 + $0x10] sm:$0xff] }
  0xe2   :  { %v396_v63 = vmax.f32 %v249_v49, 0.0  ;;  %1020 = vmatpush.bf16.msra.mxu0 %v1402_v51  ;;  %v1790_v51 = vld [vmem:[%s1836_s4] ss:$0 sm:$0xff] }
  0xe3   :  { %v445_v59 = vpack.c.bf16 %v393_v57, %v389_v55  ;;  %v446_v60 = vpack.c.bf16 %v394_v58, %v390_v56 }
  0xe5   :  { %843 = vmatmul.bf16.gmra.mxu2 %v445_v59  ;;  %892 = vmatmul.bf16.gmra.mxu3 %v446_v60 }
  0xe6   :  { %v297_v61 = vpop.f32.mrf.mxu2  ;;  %v346_v62 = vpop.f32.mrf.mxu3 }
  0xe7   :  { %v250_v13 = vpop.f32.mrf.mxu1  ;;  %v298_v4 = vadd.f32 %v297_v61, %v1705_v48  ;;  %v347_v5 = vadd.f32 %v346_v62, %v1708_v50 }
  0xe8   :  { %v251_v0 = vadd.f32 %v250_v13, %v1694_v31 }
  0xe9   :  { %v397_v12 = vmax.f32 %v298_v4, 0.0  ;;  %v398_v15 = vmax.f32 %v347_v5, 0.0 }
  0xea   :  { %v400_v1 = vmax.f32 %v251_v0, 0.0 }
  0xec   :  { %v448_v2 = vpack.c.bf16 %v400_v1, %v396_v63 }
  0xee   :  { %v299_v6 = vpop.f32.mrf.mxu2  ;;  %v348_v7 = vpop.f32.mrf.mxu3  ;;  %760 = vmatmul.bf16.gmra.mxu0 %v1696_v36  ;;  %799 = vmatmul.bf16.gmra.mxu1 %v448_v2 }
  0xef   :  { %v300_v9 = vadd.f32 %v299_v6, %v1705_v48  ;;  %v349_v10 = vadd.f32 %v348_v7, %v1708_v50  ;;  %v253_v11 = vpop.f32.mrf.mxu1 }
  0xf0   :  { %v254_v20 = vadd.f32 %v253_v11, %v1694_v31 }
  0xf1   :  { %v401_v16 = vmax.f32 %v300_v9, 0.0  ;;  %v402_v17 = vmax.f32 %v349_v10, 0.0 }
  0xf2   :  { %v404_v22 = vmax.f32 %v254_v20, 0.0 }
  0xf3   :  { %v449_v18 = vpack.c.bf16 %v401_v16, %v397_v12  ;;  %v450_v8 = vpack.c.bf16 %v402_v17, %v398_v15 }
  0xf5   :  { %848 = vmatmul.bf16.gmra.mxu2 %v449_v18  ;;  %897 = vmatmul.bf16.gmra.mxu3 %v450_v8 }
  0xf6   :  { %v302_v52 = vpop.f32.mrf.mxu2  ;;  %v351_v21 = vpop.f32.mrf.mxu3 }
  0xf7   :  { %v255_v36 = vpop.f32.mrf.mxu1  ;;  %v303_v19 = vadd.f32 %v302_v52, %v1705_v48  ;;  %v352_v27 = vadd.f32 %v351_v21, %v1708_v50 }
  0xf8   :  { %v256_v23 = vadd.f32 %v255_v36, %v1694_v31 }
  0xf9   :  { %v405_v34 = vmax.f32 %v303_v19, 0.0  ;;  %v406_v35 = vmax.f32 %v352_v27, 0.0 }
  0xfa   :  { %v408_v24 = vmax.f32 %v256_v23, 0.0 }
  0xfc   :  { %v452_v25 = vpack.c.bf16 %v408_v24, %v404_v22 }
  0xfe   :  { %v304_v28 = vpop.f32.mrf.mxu2  ;;  %v353_v29 = vpop.f32.mrf.mxu3  ;;  %765 = vmatmul.bf16.gmra.mxu0 %v1685_v14  ;;  %804 = vmatmul.bf16.gmra.mxu1 %v452_v25 }
  0xff   :  { %v305_v30 = vadd.f32 %v304_v28, %v1705_v48  ;;  %v354_v32 = vadd.f32 %v353_v29, %v1708_v50  ;;  %v258_v33 = vpop.f32.mrf.mxu1 }
 0x100   :  { %v259_v42 = vadd.f32 %v258_v33, %v1694_v31 }
 0x101   :  { %v409_v38 = vmax.f32 %v305_v30, 0.0  ;;  %v410_v39 = vmax.f32 %v354_v32, 0.0 }
 0x102   :  { %v412_v45 = vmax.f32 %v259_v42, 0.0 }
 0x103   :  { %v453_v40 = vpack.c.bf16 %v409_v38, %v405_v34  ;;  %v454_v41 = vpack.c.bf16 %v410_v39, %v406_v35  ;;  %v1400_v35 = vld [vmem:[%s1837_s5] sm:$0xff] }
 0x105   :  { %853 = vmatmul.bf16.gmra.mxu2 %v453_v40  ;;  %902 = vmatmul.bf16.gmra.mxu3 %v454_v41 }
 0x106   :  { %v307_v43 = vpop.f32.mrf.mxu2  ;;  %v356_v44 = vpop.f32.mrf.mxu3 }
 0x107   :  { %v260_v14 = vpop.f32.mrf.mxu1  ;;  %v308_v54 = vadd.f32 %v307_v43, %v1705_v48  ;;  %v357_v55 = vadd.f32 %v356_v44, %v1708_v50 }
 0x108   :  { %v261_v46 = vadd.f32 %v260_v14, %v1694_v31 }
 0x109   :  { %v413_v49 = vmax.f32 %v308_v54, 0.0  ;;  %v414_v61 = vmax.f32 %v357_v55, 0.0 }
 0x10a   :  { %v416_v47 = vmax.f32 %v261_v46, 0.0 }
 0x10c   :  { %v456_v53 = vpack.c.bf16 %v416_v47, %v412_v45 }
 0x10e   :  { %v309_v56 = vpop.f32.mrf.mxu2  ;;  %v358_v57 = vpop.f32.mrf.mxu3  ;;  %770 = vmatmul.bf16.gmra.mxu0 %v1698_v37  ;;  %809 = vmatmul.bf16.gmra.mxu1 %v456_v53  ;;  %v1401_v37 = vld [vmem:[%s1837_s5 + $0x8] sm:$0xff] }
 0x10f   :  { %v310_v58 = vadd.f32 %v309_v56, %v1705_v48  ;;  %v359_v59 = vadd.f32 %v358_v57, %v1708_v50  ;;  %v263_v60 = vpop.f32.mrf.mxu1  ;;  %1021 = vmatpush.bf16.msra.mxu0 %v1401_v37 }
 0x110   :  { %v264_v1 = vadd.f32 %v263_v60, %v1694_v31 }
 0x111   :  { %v417_v62 = vmax.f32 %v310_v58, 0.0  ;;  %v418_v13 = vmax.f32 %v359_v59, 0.0 }
 0x112   :  { %v420_v5 = vmax.f32 %v264_v1, 0.0 }
 0x113   :  { %v457_v63 = vpack.c.bf16 %v417_v62, %v413_v49  ;;  %v458_v0 = vpack.c.bf16 %v418_v13, %v414_v61  ;;  %1022 = vmatpush.bf16.msra.mxu0 %v1400_v35 }
 0x115   :  { %858 = vmatmul.bf16.gmra.mxu2 %v457_v63  ;;  %907 = vmatmul.bf16.gmra.mxu3 %v458_v0 }
 0x116   :  { %v312_v2 = vpop.f32.mrf.mxu2  ;;  %v361_v3 = vpop.f32.mrf.mxu3 }
 0x117   :  { %v265_v4 = vpop.f32.mrf.mxu1  ;;  %v313_v10 = vadd.f32 %v312_v2, %v1705_v48  ;;  %v362_v11 = vadd.f32 %v361_v3, %v1708_v50 }
 0x118   :  { %v266_v6 = vadd.f32 %v265_v4, %v1694_v31 }
 0x119   :  { %v421_v8 = vmax.f32 %v313_v10, 0.0  ;;  %v422_v20 = vmax.f32 %v362_v11, 0.0 }
 0x11a   :  { %v424_v7 = vmax.f32 %v266_v6, 0.0 }
 0x11b   :  { %v736_v36 = vpop.f32.mrf.mxu0 }
 0x11c   :  { %v460_v9 = vpack.c.bf16 %v424_v7, %v420_v5 }
 0x11e   :  { %v314_v12 = vpop.f32.mrf.mxu2  ;;  %v363_v15 = vpop.f32.mrf.mxu3  ;;  %814 = vmatmul.bf16.gmra.mxu1 %v460_v9 }
 0x11f   :  { %v315_v16 = vadd.f32 %v314_v12, %v1705_v48  ;;  %v364_v17 = vadd.f32 %v363_v15, %v1708_v50  ;;  %v268_v18 = vpop.f32.mrf.mxu1 }
 0x120   :  { %v269_v24 = vadd.f32 %v268_v18, %v1694_v31 }
 0x121   :  { %v425_v52 = vmax.f32 %v315_v16, 0.0  ;;  %v426_v21 = vmax.f32 %v364_v17, 0.0 }
 0x122   :  { %v428_v27 = vmax.f32 %v269_v24, 0.0 }
 0x123   :  { %v461_v22 = vpack.c.bf16 %v425_v52, %v421_v8  ;;  %v462_v23 = vpack.c.bf16 %v426_v21, %v422_v20  ;;  %v738_v32 = vpop.f32.mrf.mxu0 }
 0x124   :  { %v739_v59 = vadd.f32 %v1790_v51, %v738_v32 }
 0x125   :  { %863 = vmatmul.bf16.gmra.mxu2 %v461_v22  ;;  %912 = vmatmul.bf16.gmra.mxu3 %v462_v23 }
 0x126   :  { %v317_v25 = vpop.f32.mrf.mxu2  ;;  %v366_v26 = vpop.f32.mrf.mxu3 }
 0x127   :  { %v270_v19 = vpop.f32.mrf.mxu1  ;;  %v318_v33 = vadd.f32 %v317_v25, %v1705_v48  ;;  %v367_v34 = vadd.f32 %v366_v26, %v1708_v50 }
 0x128   :  { %v271_v28 = vadd.f32 %v270_v19, %v1694_v31 }
 0x129   :  { %v429_v31 = vmax.f32 %v318_v33, 0.0  ;;  %v430_v42 = vmax.f32 %v367_v34, 0.0 }
 0x12a   :  { %v432_v29 = vmax.f32 %v271_v28, 0.0 }
 0x12b   :  { %v741_v46 = vpop.f32.mrf.mxu0 }
 0x12c   :  { %v464_v30 = vpack.c.bf16 %v432_v29, %v428_v27  ;;  %v742_v4 = vadd.f32 %v1790_v51, %v741_v46 }
 0x12e   :  { %v319_v38 = vpop.f32.mrf.mxu2  ;;  %v368_v39 = vpop.f32.mrf.mxu3  ;;  %819 = vmatmul.bf16.gmra.mxu1 %v464_v30 }
 0x12f   :  { %v320_v40 = vadd.f32 %v319_v38, %v1705_v48  ;;  %v369_v41 = vadd.f32 %v368_v39, %v1708_v50  ;;  %v737_v50 = vadd.f32 %v1790_v51, %v736_v36 }
 0x131   :  { %v433_v43 = vmax.f32 %v320_v40, 0.0  ;;  %v434_v44 = vmax.f32 %v369_v41, 0.0 }
 0x133   :  { %v465_v14 = vpack.c.bf16 %v433_v43, %v429_v31  ;;  %v466_v45 = vpack.c.bf16 %v434_v44, %v430_v42  ;;  %v743_v53 = vpop.f32.mrf.mxu0 }
 0x134   :  { %v744_v11 = vadd.f32 %v1790_v51, %v743_v53 }
 0x135   :  { %868 = vmatmul.bf16.gmra.mxu2 %v465_v14  ;;  %917 = vmatmul.bf16.gmra.mxu3 %v466_v45 }
 0x13b   :  { %v785_v47 = vpop.f32.mrf.mxu1  ;;  %v746_v56 = vpop.f32.mrf.mxu0 }
 0x13c   :  { %v786_v57 = vadd.f32 %v785_v47, %v737_v50  ;;  %v747_v26 = vadd.f32 %v1790_v51, %v746_v56 }
 0x143   :  { %v787_v48 = vpop.f32.mrf.mxu1  ;;  %v748_v37 = vpop.f32.mrf.mxu0 }
 0x144   :  { %v788_v49 = vadd.f32 %v787_v48, %v739_v59  ;;  %v749_v29 = vadd.f32 %v1790_v51, %v748_v37 }
 0x148   :  { %v834_v54 = vpop.f32.mrf.mxu2  ;;  %v883_v55 = vpop.f32.mrf.mxu3 }
 0x149   :  { %v835_v60 = vadd.f32 %v834_v54, %v786_v57 }
 0x14b   :  { %v790_v58 = vpop.f32.mrf.mxu1  ;;  %v884_v13 = vadd.f32 %v883_v55, %v835_v60  ;;  %v751_v15 = vpop.f32.mrf.mxu0 }
 0x14c   :  { %v791_v9 = vadd.f32 %v790_v58, %v742_v4  ;;  %v752_v45 = vadd.f32 %v1790_v51, %v751_v15 }
 0x14d   :  { %v923_v2 = vmax.f32 %v884_v13, 0.0 }
 0x150   :  { %v836_v61 = vpop.f32.mrf.mxu2  ;;  %v885_v62 = vpop.f32.mrf.mxu3 }
 0x151   :  { %v837_v63 = vadd.f32 %v836_v61, %v788_v49 }
 0x153   :  { %v886_v0 = vadd.f32 %v885_v62, %v837_v63  ;;  %v792_v1 = vpop.f32.mrf.mxu1  ;;  %v753_v19 = vpop.f32.mrf.mxu0 }
 0x154   :  { %v793_v16 = vadd.f32 %v792_v1, %v744_v11  ;;  %v754_v53 = vadd.f32 %v1790_v51, %v753_v19 }
 0x155   :  { %v924_v3 = vmax.f32 %v886_v0, 0.0 }
 0x157   :  { %v939_v5 = vpack.c.bf16 %v924_v3, %v923_v2 }
 0x158   :  { %v839_v6 = vpop.f32.mrf.mxu2  ;;  %v888_v7 = vpop.f32.mrf.mxu3 }
 0x159   :  { %1023 = vmatmul.bf16.vlgmr.msra.gmra.mxu0 %v939_v5  ;;  %v840_v12 = vadd.f32 %v839_v6, %v791_v9 }
 0x15b   :  { %v795_v10 = vpop.f32.mrf.mxu1  ;;  %v889_v8 = vadd.f32 %v888_v7, %v840_v12  ;;  %v756_v39 = vpop.f32.mrf.mxu0 }
 0x15c   :  { %v796_v27 = vadd.f32 %v795_v10, %v747_v26  ;;  %v757_v1 = vadd.f32 %v1790_v51, %v756_v39 }
 0x15d   :  { %v925_v36 = vmax.f32 %v889_v8, 0.0 }
 0x160   :  { %v841_v17 = vpop.f32.mrf.mxu2  ;;  %v890_v18 = vpop.f32.mrf.mxu3 }
 0x161   :  { %v842_v20 = vadd.f32 %v841_v17, %v793_v16 }
 0x163   :  { %v891_v52 = vadd.f32 %v890_v18, %v842_v20  ;;  %v797_v21 = vpop.f32.mrf.mxu1  ;;  %v758_v48 = vpop.f32.mrf.mxu0 }
 0x164   :  { %v798_v32 = vadd.f32 %v797_v21, %v749_v29  ;;  %v759_v3 = vadd.f32 %v1790_v51, %v758_v48 }
 0x165   :  { %v926_v22 = vmax.f32 %v891_v52, 0.0 }
 0x167   :  { %v940_v23 = vpack.c.bf16 %v926_v22, %v925_v36 }
 0x168   :  { %v844_v24 = vpop.f32.mrf.mxu2  ;;  %v893_v25 = vpop.f32.mrf.mxu3 }
 0x169   :  { %1028 = vmatmul.bf16.gmra.mxu0 %v940_v23  ;;  %v845_v30 = vadd.f32 %v844_v24, %v796_v27 }
 0x16b   :  { %v800_v28 = vpop.f32.mrf.mxu1  ;;  %v894_v35 = vadd.f32 %v893_v25, %v845_v30  ;;  %v761_v62 = vpop.f32.mrf.mxu0 }
 0x16c   :  { %v801_v46 = vadd.f32 %v800_v28, %v752_v45  ;;  %v762_v52 = vadd.f32 %v1790_v51, %v761_v62 }
 0x16d   :  { %v927_v31 = vmax.f32 %v894_v35, 0.0 }
 0x170   :  { %v846_v33 = vpop.f32.mrf.mxu2  ;;  %v895_v34 = vpop.f32.mrf.mxu3 }
 0x171   :  { %v847_v38 = vadd.f32 %v846_v33, %v798_v32 }
 0x173   :  { %v896_v40 = vadd.f32 %v895_v34, %v847_v38  ;;  %v802_v41 = vpop.f32.mrf.mxu1  ;;  %v763_v9 = vpop.f32.mrf.mxu0 }
 0x174   :  { %v803_v54 = vadd.f32 %v802_v41, %v754_v53  ;;  %v764_v22 = vadd.f32 %v1790_v51, %v763_v9 }
 0x175   :  { %v928_v42 = vmax.f32 %v896_v40, 0.0 }
 0x177   :  { %v941_v43 = vpack.c.bf16 %v928_v42, %v927_v31 }
 0x178   :  { %v849_v44 = vpop.f32.mrf.mxu2  ;;  %v898_v14 = vpop.f32.mrf.mxu3 }
 0x179   :  { %1033 = vmatmul.bf16.gmra.mxu0 %v941_v43  ;;  %v850_v50 = vadd.f32 %v849_v44, %v801_v46 }
 0x17b   :  { %v805_v47 = vpop.f32.mrf.mxu1  ;;  %v899_v57 = vadd.f32 %v898_v14, %v850_v50  ;;  %v766_v21 = vpop.f32.mrf.mxu0 }
 0x17c   :  { %v806_v37 = vadd.f32 %v805_v47, %v757_v1  ;;  %v767_v40 = vadd.f32 %v1790_v51, %v766_v21 }
 0x17d   :  { %v929_v49 = vmax.f32 %v899_v57, 0.0 }
 0x180   :  { %v851_v55 = vpop.f32.mrf.mxu2  ;;  %v900_v56 = vpop.f32.mrf.mxu3 }
 0x181   :  { %v852_v58 = vadd.f32 %v851_v55, %v803_v54 }
 0x183   :  { %v901_v59 = vadd.f32 %v900_v56, %v852_v58  ;;  %v807_v60 = vpop.f32.mrf.mxu1  ;;  %v768_v30 = vpop.f32.mrf.mxu0 }
 0x184   :  { %v808_v5 = vadd.f32 %v807_v60, %v759_v3  ;;  %v769_v31 = vadd.f32 %v1790_v51, %v768_v30 }
 0x185   :  { %v930_v61 = vmax.f32 %v901_v59, 0.0 }
 0x187   :  { %v942_v13 = vpack.c.bf16 %v930_v61, %v929_v49 }
 0x188   :  { %v854_v63 = vpop.f32.mrf.mxu2  ;;  %v903_v0 = vpop.f32.mrf.mxu3 }
 0x189   :  { %1038 = vmatmul.bf16.gmra.mxu0 %v942_v13  ;;  %v855_v4 = vadd.f32 %v854_v63, %v806_v37 }
 0x18b   :  { %v810_v2 = vpop.f32.mrf.mxu1  ;;  %v904_v10 = vadd.f32 %v903_v0, %v855_v4  ;;  %v771_v43 = vpop.f32.mrf.mxu0 }
 0x18c   :  { %v811_v36 = vadd.f32 %v810_v2, %v762_v52  ;;  %v772_v58 = vadd.f32 %v1790_v51, %v771_v43 }
 0x18d   :  { %v931_v16 = vmax.f32 %v904_v10, 0.0 }
 0x190   :  { %v856_v6 = vpop.f32.mrf.mxu2  ;;  %v905_v7 = vpop.f32.mrf.mxu3 }
 0x191   :  { %v857_v11 = vadd.f32 %v856_v6, %v808_v5  ;;  %v1811_v6 = vld [vmem:[%s1838_s6] ss:$0 sm:$0xff]  ;;  %s1538_s6 = smov [#allocation7]  }
 0x192   :  { %s1100_s22 = sshll.u32 %s1538_s6, 4  ;;  %s1101_s22 = int_to_ptr.vmem [resolvable:$true] %s1100_s22 }
 0x193   :  { %v906_v12 = vadd.f32 %v905_v7, %v857_v11  ;;  %v812_v15 = vpop.f32.mrf.mxu1  ;;  %v773_v59 = vpop.f32.mrf.mxu0 }
 0x194   :  { %v813_v25 = vadd.f32 %v812_v15, %v764_v22  ;;  %v774_v61 = vadd.f32 %v1790_v51, %v773_v59 }
 0x195   :  { %v932_v17 = vmax.f32 %v906_v12, 0.0 }
 0x197   :  { %v943_v18 = vpack.c.bf16 %v932_v17, %v931_v16 }
 0x198   :  { %v859_v8 = vpop.f32.mrf.mxu2  ;;  %v908_v20 = vpop.f32.mrf.mxu3 }
 0x199   :  { %1043 = vmatmul.bf16.gmra.mxu0 %v943_v18  ;;  %v860_v23 = vadd.f32 %v859_v8, %v811_v36 }
 0x19b   :  { %v815_v24 = vpop.f32.mrf.mxu1  ;;  %v909_v27 = vadd.f32 %v908_v20, %v860_v23 }
 0x19c   :  { %v816_v41 = vadd.f32 %v815_v24, %v767_v40 }
 0x19d   :  { %v933_v32 = vmax.f32 %v909_v27, 0.0 }
 0x1a0   :  { %v861_v26 = vpop.f32.mrf.mxu2  ;;  %v910_v19 = vpop.f32.mrf.mxu3 }
 0x1a1   :  { %v862_v28 = vadd.f32 %v861_v26, %v813_v25 }
 0x1a3   :  { %v911_v29 = vadd.f32 %v910_v19, %v862_v28  ;;  %v817_v35 = vpop.f32.mrf.mxu1 }
 0x1a4   :  { %v818_v44 = vadd.f32 %v817_v35, %v769_v31 }
 0x1a5   :  { %v934_v33 = vmax.f32 %v911_v29, 0.0 }
 0x1a7   :  { %v944_v34 = vpack.c.bf16 %v934_v33, %v933_v32 }
 0x1a8   :  { %v864_v38 = vpop.f32.mrf.mxu2  ;;  %v913_v39 = vpop.f32.mrf.mxu3 }
 0x1a9   :  { %1048 = vmatmul.bf16.gmra.mxu0 %v944_v34  ;;  %v865_v42 = vadd.f32 %v864_v38, %v816_v41 }
 0x1ab   :  { %v914_v46 = vadd.f32 %v913_v39, %v865_v42  ;;  %v820_v53 = vpop.f32.mrf.mxu1 }
 0x1ac   :  { %v821_v60 = vadd.f32 %v820_v53, %v772_v58 }
 0x1ad   :  { %v935_v50 = vmax.f32 %v914_v46, 0.0 }
 0x1b0   :  { %v866_v14 = vpop.f32.mrf.mxu2  ;;  %v915_v45 = vpop.f32.mrf.mxu3 }
 0x1b1   :  { %v867_v47 = vadd.f32 %v866_v14, %v818_v44 }
 0x1b3   :  { %v916_v48 = vadd.f32 %v915_v45, %v867_v47  ;;  %v822_v49 = vpop.f32.mrf.mxu1 }
 0x1b4   :  { %v823_v13 = vadd.f32 %v822_v49, %v774_v61 }
 0x1b5   :  { %v936_v54 = vmax.f32 %v916_v48, 0.0 }
 0x1b7   :  { %v945_v55 = vpack.c.bf16 %v936_v54, %v935_v50 }
 0x1b8   :  { %v869_v56 = vpop.f32.mrf.mxu2  ;;  %v918_v57 = vpop.f32.mrf.mxu3 }
 0x1b9   :  { %1053 = vmatmul.bf16.gmra.mxu0 %v945_v55  ;;  %v870_v62 = vadd.f32 %v869_v56, %v821_v60 }
 0x1bb   :  { %v919_v0 = vadd.f32 %v918_v57, %v870_v62 }
 0x1bd   :  { %v937_v3 = vmax.f32 %v919_v0, 0.0 }
 0x1c0   :  { %v871_v63 = vpop.f32.mrf.mxu2  ;;  %v920_v37 = vpop.f32.mrf.mxu3 }
 0x1c1   :  { %v872_v1 = vadd.f32 %v871_v63, %v823_v13 }
 0x1c3   :  { %v921_v2 = vadd.f32 %v920_v37, %v872_v1 }
 0x1c5   :  { %v938_v4 = vmax.f32 %v921_v2, 0.0 }
 0x1c7   :  { %v946_v5 = vpack.c.bf16 %v938_v4, %v937_v3 }
 0x1c9   :  { %1058 = vmatmul.bf16.gmra.mxu0 %v946_v5 }
 0x1d6   :  { %v1024_v7 = vpop.f32.mrf.mxu0 }
 0x1d7   :  { %v1025_v9 = vadd.f32 %v1811_v6, %v1024_v7 }
 0x1d9   :  { %1422 = vtanh.f32 %v1025_v9 }
 0x1de   :  { %v1026_v51 = vpop.f32.mrf.mxu0 }
 0x1df   :  { %v1423_v10 = vpop.eup %1422  ;;  %v1027_v11 = vadd.f32 %v1811_v6, %v1026_v51 }
 0x1e0   :  { %1080 = vst [vmem:[#allocation7] sm:$0xff] %v1423_v10 }
 0x1e1   :  { %1424 = vtanh.f32 %v1027_v11 }
 0x1e6   :  { %v1029_v12 = vpop.f32.mrf.mxu0 }
 0x1e7   :  { %v1425_v15 = vpop.eup %1424  ;;  %v1030_v16 = vadd.f32 %v1811_v6, %v1029_v12 }
 0x1e8   :  { %1081 = vst [vmem:[#allocation7 + $0x8] sm:$0xff] %v1425_v15 }
 0x1e9   :  { %1426 = vtanh.f32 %v1030_v16 }
 0x1ee   :  { %v1031_v17 = vpop.f32.mrf.mxu0 }
 0x1ef   :  { %v1427_v18 = vpop.eup %1426  ;;  %v1032_v8 = vadd.f32 %v1811_v6, %v1031_v17 }
 0x1f0   :  { %1082 = vst [vmem:[#allocation7 + $0x10] sm:$0xff] %v1427_v18 }
 0x1f1   :  { %1428 = vtanh.f32 %v1032_v8 }
 0x1f6   :  { %v1034_v20 = vpop.f32.mrf.mxu0 }
 0x1f7   :  { %v1429_v52 = vpop.eup %1428  ;;  %v1035_v21 = vadd.f32 %v1811_v6, %v1034_v20 }
 0x1f8   :  { %1083 = vst [vmem:[#allocation7 + $0x18] sm:$0xff] %v1429_v52 }
 0x1f9   :  { %1430 = vtanh.f32 %v1035_v21 }
 0x1fe   :  { %v1036_v36 = vpop.f32.mrf.mxu0 }
 0x1ff   :  { %v1431_v22 = vpop.eup %1430  ;;  %v1037_v23 = vadd.f32 %v1811_v6, %v1036_v36 }
 0x200   :  { %1084 = vst [vmem:[#allocation7 + $0x20] sm:$0xff] %v1431_v22 }
 0x201   :  { %1432 = vtanh.f32 %v1037_v23 }
 0x206   :  { %v1039_v24 = vpop.f32.mrf.mxu0 }
 0x207   :  { %v1433_v25 = vpop.eup %1432  ;;  %v1040_v26 = vadd.f32 %v1811_v6, %v1039_v24 }
 0x208   :  { %1085 = vst [vmem:[#allocation7 + $0x28] sm:$0xff] %v1433_v25 }
 0x209   :  { %1434 = vtanh.f32 %v1040_v26 }
 0x20e   :  { %v1041_v19 = vpop.f32.mrf.mxu0 }
 0x20f   :  { %v1435_v27 = vpop.eup %1434  ;;  %v1042_v28 = vadd.f32 %v1811_v6, %v1041_v19 }
 0x210   :  { %1086 = vst [vmem:[#allocation7 + $0x30] sm:$0xff] %v1435_v27 }
 0x211   :  { %1436 = vtanh.f32 %v1042_v28 }
 0x216   :  { %v1044_v29 = vpop.f32.mrf.mxu0 }
 0x217   :  { %v1437_v30 = vpop.eup %1436  ;;  %v1045_v32 = vadd.f32 %v1811_v6, %v1044_v29 }
 0x218   :  { %1087 = vst [vmem:[#allocation7 + $0x38] sm:$0xff] %v1437_v30 }
 0x219   :  { %1438 = vtanh.f32 %v1045_v32 }
 0x21e   :  { %v1046_v33 = vpop.f32.mrf.mxu0 }
 0x21f   :  { %v1439_v34 = vpop.eup %1438  ;;  %v1047_v35 = vadd.f32 %v1811_v6, %v1046_v33 }
 0x220   :  { %1088 = vst [vmem:[#allocation7 + $0x40] sm:$0xff] %v1439_v34 }
 0x221   :  { %1440 = vtanh.f32 %v1047_v35 }
 0x226   :  { %v1049_v38 = vpop.f32.mrf.mxu0 }
 0x227   :  { %v1441_v39 = vpop.eup %1440  ;;  %v1050_v40 = vadd.f32 %v1811_v6, %v1049_v38 }
 0x228   :  { %1089 = vst [vmem:[#allocation7 + $0x48] sm:$0xff] %v1441_v39 }
 0x229   :  { %1442 = vtanh.f32 %v1050_v40 }
 0x22e   :  { %v1051_v41 = vpop.f32.mrf.mxu0 }
 0x22f   :  { %v1443_v31 = vpop.eup %1442  ;;  %v1052_v42 = vadd.f32 %v1811_v6, %v1051_v41 }
 0x230   :  { %1090 = vst [vmem:[#allocation7 + $0x50] sm:$0xff] %v1443_v31 }
 0x231   :  { %1444 = vtanh.f32 %v1052_v42 }
 0x236   :  { %v1054_v43 = vpop.f32.mrf.mxu0 }
 0x237   :  { %v1445_v44 = vpop.eup %1444  ;;  %v1055_v14 = vadd.f32 %v1811_v6, %v1054_v43 }
 0x238   :  { %1091 = vst [vmem:[#allocation7 + $0x58] sm:$0xff] %v1445_v44 }
 0x239   :  { %1446 = vtanh.f32 %v1055_v14 }
 0x23e   :  { %v1056_v45 = vpop.f32.mrf.mxu0 }
 0x23f   :  { %v1447_v46 = vpop.eup %1446  ;;  %v1057_v47 = vadd.f32 %v1811_v6, %v1056_v45 }
 0x240   :  { %1092 = vst [vmem:[#allocation7 + $0x60] sm:$0xff] %v1447_v46 }
 0x241   :  { %1448 = vtanh.f32 %v1057_v47 }
 0x246   :  { %v1059_v53 = vpop.f32.mrf.mxu0 }
 0x247   :  { %v1449_v48 = vpop.eup %1448  ;;  %v1060_v50 = vadd.f32 %v1811_v6, %v1059_v53 }
 0x248   :  { %1093 = vst [vmem:[#allocation7 + $0x68] sm:$0xff] %v1449_v48 }
 0x249   :  { %1450 = vtanh.f32 %v1060_v50 }
 0x24e   :  { %v1061_v54 = vpop.f32.mrf.mxu0 }
 0x24f   :  { %v1451_v55 = vpop.eup %1450  ;;  %v1062_v56 = vadd.f32 %v1811_v6, %v1061_v54 }
 0x250   :  { %1094 = vst [vmem:[#allocation7 + $0x70] sm:$0xff] %v1451_v55 }
 0x251   :  { %1452 = vtanh.f32 %v1062_v56 }
 0x257   :  { %v1453_v57 = vpop.eup %1452 }
 0x258   :  { %1095 = vst [vmem:[#allocation7 + $0x78] sm:$0xff] %v1453_v57 }
 0x259   :  { %1108 = dma.vmem_to_hbm [thread:$0]  %s1101_s22, 2048, %s1103_s25, [#allocation4], %s1539_s26, %s1539_s26, %s1540_s27  }
 0x25a   :  { %1530 = dma.done.wait [#allocation4], 2048  }
 0x25b   :  { %1531 = vsyncadd [#allocation4], 4294965248 }
 0x25c   :  { %1113 = vsyncpa [#allocation3], 1 }
 0x25d   :  { %1114 = vsyncpa [#allocation6], 1 }
 0x25e   :  { %1115 = vsyncpa [#allocation4], 1 }

</bundles_post_ra>
